<compile_context>
chip_gen: v7x
topology: tpu7x:2x2x1
jax: 0.10.0
libtpu: 0.0.40
codegen_flags: <defaults>
</compile_context>

<pallas_src>
import jax
import jax.numpy as jnp
from jax.experimental import pallas as pl
from jax.experimental.pallas import tpu as pltpu

_LANE = 128


def softmax_stable_kernel(x_ref, o_ref):
    # Block = (seq, lane_tile); dim 0 (the reduction axis) is fully resident.
    x = x_ref[...].astype(jnp.float32)        # f32 compute (v5e has no bf16 VPU/EUP)
    m = jnp.max(x, axis=0, keepdims=True)     # per-column max: cancels exactly vs global max
    e = jnp.exp(x - m)                        # EUP exp
    if o_ref.dtype == jnp.float32:
        # Stage the exp() temp through the output block: frees the separate
        # seq*tile f32 live range between the sum and the final multiply.
        o_ref[...] = e
        s = jnp.sum(o_ref[...], axis=0, keepdims=True)
        o_ref[...] = o_ref[...] * pl.reciprocal(s, approx=False)
    else:
        # Keep full f32 precision until the single final cast.
        s = jnp.sum(e, axis=0, keepdims=True)
        o_ref[...] = (e * pl.reciprocal(s, approx=False)).astype(o_ref.dtype)


def _per_block_budget_bytes() -> int:
    # Budget for ONE f32 block.  Per-step footprint is roughly 6-8x a block
    # (2x double-buffered input, 2x output, f32 temps), so vmem_capacity/32
    # keeps the whole pipeline comfortably inside scoped VMEM on every
    # generation (v7x: 64 MiB -> 2 MiB blocks; v5e/v6e: 128 MiB -> 4 MiB).
    try:
        cap = pltpu.get_tpu_info().vmem_capacity_bytes
    except Exception:
        cap = 64 << 20                                   # assume smallest (v7x)
    return max(1 << 20, min(4 << 20, cap // 32))


def _pick_lane_tile(seq: int, hidden: int) -> int:
    # Largest lane-dense (multiple of 128) tile such that
    #   * one f32 block (seq * tile * 4 B) stays within the per-block budget,
    #   * the grid has >= 2 steps whenever hidden allows a >=128-lane split
    #     (so v7x's two TensorCores both get columns to work on).
    # Widths <= 128 lanes fall back to a single full-width block.
    if hidden <= _LANE:
        return hidden
    budget = _per_block_budget_bytes()
    cap = max(_LANE, (budget // (seq * 4)) // _LANE * _LANE)
    half = -(-hidden // 2)                   # ceil(hidden / 2)
    half = (-(-half // _LANE)) * _LANE       # rounded up to a lane multiple
    return max(_LANE, min(cap, half, hidden))


def softmax_stable(x):
    seq, hidden = x.shape
    tile = _pick_lane_tile(seq, hidden)
    grid = (pl.cdiv(hidden, tile),)

    block_bytes = seq * tile * 4
    # Per-step footprint: 2x double-buffered input + 2x output + f32 temps,
    # plus headroom.  Clamped so the request stays legal on v7x (64 MiB phys).
    vmem_limit = int(min(max(8 * block_bytes + (1 << 20), 16 << 20), 48 << 20))

    # TODO(synk): if seq ever exceeds what fits in one VMEM block, add a second
    # ("arbitrary", last) grid axis over seq with a running-sum accumulator and
    # a dedicated max pass (a per-seq-tile max alone is NOT enough; it needs an
    # online-softmax rescale of the running sum).

    return pl.pallas_call(
        softmax_stable_kernel,
        out_shape=jax.ShapeDtypeStruct(x.shape, x.dtype),
        grid_spec=pltpu.PrefetchScalarGridSpec(
            num_scalar_prefetch=0,
            grid=grid,
            in_specs=[pl.BlockSpec((seq, tile), lambda j: (0, j))],
            out_specs=pl.BlockSpec((seq, tile), lambda j: (0, j)),
        ),
        compiler_params=pltpu.CompilerParams(
            # Lane tiles (columns) are fully independent -> v7x's 2 TCs split them.
            dimension_semantics=("parallel",),
            vmem_limit_bytes=vmem_limit,
        ),
        cost_estimate=pl.CostEstimate(
            flops=4 * seq * hidden,
            transcendentals=seq * hidden,
            bytes_accessed=8 * seq * hidden,
        ),
    )(x)


def softmax_stable_ref(x):
    # Pure-JAX reference mirroring the PyTorch module EXACTLY (global max).
    x32 = x.astype(jnp.float32)
    e = jnp.exp(x32 - jnp.max(x32))
    return (e / jnp.sum(e, axis=0, keepdims=True)).astype(x.dtype)


if __name__ == "__main__":
    key = jax.random.PRNGKey(0)

    # Primary shape implied by the module's usage: (seq=8, hidden=32).
    seq, hidden = 8, 32
    x = jax.random.normal(key, (seq, hidden), dtype=jnp.float32)
    out = jax.block_until_ready(softmax_stable(x))
    ref = softmax_stable_ref(x)
    assert out.shape == x.shape and out.dtype == x.dtype
    assert jnp.allclose(out, ref, atol=1e-6, rtol=1e-6), "mismatch vs reference (8,32)"

    # Tiled path: hidden split into two lane-dense blocks (grid=(2,)).
    x2 = jax.random.normal(jax.random.PRNGKey(1), (16, 1024), dtype=jnp.float32)
    out2 = jax.block_until_ready(softmax_stable(x2))
    assert jnp.allclose(out2, softmax_stable_ref(x2), atol=1e-6, rtol=1e-6), \
        "mismatch vs reference (16,1024)"

    # Irregular width: cdiv grid with a padded partial last block.
    x3 = jax.random.normal(jax.random.PRNGKey(2), (8, 200), dtype=jnp.float32)
    out3 = jax.block_until_ready(softmax_stable(x3))
    assert jnp.allclose(out3, softmax_stable_ref(x3), atol=1e-6, rtol=1e-6), \
        "mismatch vs reference (8,200)"

    print("KERNEL_OK")
</pallas_src>

<mosaic_0001>
module attributes {stable_mosaic.version = 11 : i64} {
  func.func @softmax_stable_kernel(%arg0: i32, %arg1: memref<8x32xf32, #tpu.memory_space<vmem>>, %arg2: memref<8x32xf32, #tpu.memory_space<vmem>>) attributes {dimension_semantics = [#tpu.dimension_semantics<parallel>], iteration_bounds = array<i64: 1>, scalar_prefetch = 0 : i64, scratch_operands = 0 : i64, tpu.core_type = #tpu.core_type<tc>, window_params = [{transform_indices = @transform_0, window_bounds = array<i64: 8, 32>}, {transform_indices = @transform_1, window_bounds = array<i64: 8, 32>}]} {
    %c0 = arith.constant 0 : index
    %c0_0 = arith.constant 0 : index
    %0 = vector.load %arg1[%c0, %c0_0] : memref<8x32xf32, #tpu.memory_space<vmem>>, vector<8x32xf32>
    %cst = arith.constant dense<0xFF800000> : vector<32xf32>
    %1 = vector.multi_reduction <maximumf>, %0, %cst [0] : vector<8x32xf32> to vector<32xf32>
    %2 = vector.shape_cast %1 : vector<32xf32> to vector<1x32xf32>
    %3 = vector.broadcast %2 : vector<1x32xf32> to vector<8x32xf32>
    %4 = arith.subf %0, %3 : vector<8x32xf32>
    %5 = math.exp %4 : vector<8x32xf32>
    %c0_1 = arith.constant 0 : index
    %c0_2 = arith.constant 0 : index
    %6 = vector.load %arg2[%c0_1, %c0_2] : memref<8x32xf32, #tpu.memory_space<vmem>>, vector<8x32xf32>
    tpu.vector_store %arg2[%c0_1, %c0_2], %5 {strides = array<i32>} : memref<8x32xf32, #tpu.memory_space<vmem>>, vector<8x32xf32>,
    %c0_3 = arith.constant 0 : index
    %c0_4 = arith.constant 0 : index
    %7 = vector.load %arg2[%c0_3, %c0_4] : memref<8x32xf32, #tpu.memory_space<vmem>>, vector<8x32xf32>
    %cst_5 = arith.constant dense<0.000000e+00> : vector<32xf32>
    %8 = vector.multi_reduction <add>, %7, %cst_5 [0] : vector<8x32xf32> to vector<32xf32>
    %9 = vector.shape_cast %8 : vector<32xf32> to vector<1x32xf32>
    %c0_6 = arith.constant 0 : index
    %c0_7 = arith.constant 0 : index
    %10 = vector.load %arg2[%c0_6, %c0_7] : memref<8x32xf32, #tpu.memory_space<vmem>>, vector<8x32xf32>
    %11 = tpu.reciprocal %9 : vector<1x32xf32> -> vector<1x32xf32>
    %12 = vector.broadcast %11 : vector<1x32xf32> to vector<8x32xf32>
    %13 = arith.mulf %10, %12 : vector<8x32xf32>
    %c0_8 = arith.constant 0 : index
    %c0_9 = arith.constant 0 : index
    %14 = vector.load %arg2[%c0_8, %c0_9] : memref<8x32xf32, #tpu.memory_space<vmem>>, vector<8x32xf32>
    tpu.vector_store %arg2[%c0_8, %c0_9], %13 {strides = array<i32>} : memref<8x32xf32, #tpu.memory_space<vmem>>, vector<8x32xf32>,
    return
  }
  func.func @transform_0(%arg0: i32) -> (i32, i32) {
    %c0_i32 = arith.constant 0 : i32
    %c0_i32_0 = arith.constant 0 : i32
    return %c0_i32, %arg0 : i32, i32
  }
  func.func @transform_1(%arg0: i32) -> (i32, i32) {
    %c0_i32 = arith.constant 0 : i32
    %c0_i32_0 = arith.constant 0 : i32
    return %c0_i32, %arg0 : i32, i32
  }
}

</mosaic_0001>

<bundles_post_ra>
// kernel: tpu_custom_call.1
= control target key start
LH: loop header
LB: loop body
LE: loop exit
PB: predicated region body
PF: predicated region fallthrough
CT: control target
= control target key end

     0   :  { %6 = vsyncpa [#allocation3], 0  ;;  %s154_s0 = inlined_call_operand.hbm [shape: f32[8,32], index: 0, kind: input, shape index: {}]   ;;  %s155_s1 = inlined_call_operand.hbm [shape: f32[8,32], index: 1, kind: output, shape index: {}]  }
   0x1   :  { %7 = vsyncpa [#allocation4], 0  ;;  %s114_s6 = smov [#allocation2]   ;;  %s66_s10 = scalar_lea.hbm %s154_s0, 128 }
   0x2   :  { %s14_s7 = sshll.u32 %s114_s6, 4  ;;  %p67_p0 = scmp.ne.s32.totalorder %s154_s0, %s66_s10  ;;  %s15_s7 = int_to_ptr.vmem [resolvable:$true] %s14_s7 }
   0x3   :  { %p70_p1 = scmp.lt.u32.totalorder %s66_s10, %s154_s0 }
   0x5   :  { %p72_p2 = pnand %p70_p1, %p67_p0 }
   0x7   :  { %75 = shalt.err (!%p72_p2)
}
   0x8   :  { %s76_s15 = scalar_lea.vmem %s15_s7, 128  ;;  %p81_p4 = scmp.lt.s32.totalorder %s15_s7, %s15_s7 }
   0x9   :  { %p77_p3 = scmp.ne.s32.totalorder %s15_s7, %s76_s15  ;;  %p82_p5 = scmp.lt.s32.totalorder %s76_s15, %s76_s15 }
   0xb   :  { %p83_p6 = por %p82_p5, %p81_p4 }
   0xd   :  { %p84_p7 = pnand %p83_p6, %p77_p3 }
   0xf   :  { %87 = shalt.err (!%p84_p7)
}
  0x10   :  { %17 = dma.hbm_to_vmem [thread:$0]  %s154_s0, 128, %s15_s7, [#allocation3]  }
  0x11   :  { %110 = dma.done.wait [#allocation3], 128  }
  0x12   :  { %111 = vsyncadd [#allocation3], 4294967168  ;;  %vm22_vm0 = vcmask 261120   ;;  %v21_v0 = vld [vmem:[#allocation2] sm:$0xff]  ;;  %s115_s0 = smov [#allocation5]  }
  0x13   :  { %v23_v1 = vsel %vm22_vm0, %v21_v0, -inf  ;;  %s51_s18 = sshll.u32 %s115_s0, 4  ;;  %s52_s18 = int_to_ptr.vmem [resolvable:$true] %s51_s18 }
  0x14   :  { %v24_v2 = vrot.slane %v23_v1, 4  ;;  %s88_s19 = scalar_lea.vmem %s52_s18, 128  ;;  %p93_p9 = scmp.lt.s32.totalorder %s52_s18, %s52_s18 }
  0x15   :  { %p89_p8 = scmp.ne.s32.totalorder %s52_s18, %s88_s19  ;;  %p94_p10 = scmp.lt.s32.totalorder %s88_s19, %s88_s19 }
  0x16   :  { %v25_v3 = vmax.f32 %v23_v1, %v24_v2 }
  0x17   :  { %p95_p11 = por %p94_p10, %p93_p9 }
  0x18   :  { %v26_v4 = vrot.slane %v25_v3, 2 }
  0x19   :  { %p96_p12 = pnand %p95_p11, %p89_p8 }
  0x1a   :  { %v27_v5 = vmax.f32 %v25_v3, %v26_v4 }
  0x1c   :  { %v28_v6 = vrot.slane %v27_v5, 1 }
  0x1e   :  { %v29_v7 = vmax.f32 %v27_v5, %v28_v6 }
  0x20   :  { %v30_v8 = vsub.f32 %v21_v0, %v29_v7 }
  0x22   :  { %v31_v9 = vmul.f32 1.442695, %v30_v8 }
  0x24   :  { %62 = vpow2.f32 %v31_v9 }
  0x2e   :  { %v63_v10 = vpop.eup %62 }
  0x2f   :  { %33 = vst.msk [vmem:[#allocation5] sm:$0xff] %vm22_vm0, %v63_v10 }
  0x36   :  { %v34_v11 = vld [vmem:[#allocation5] sm:$0xff] }
  0x37   :  { %v35_v12 = vsel %vm22_vm0, %v34_v11, 0.0 }
  0x38   :  { %v36_v13 = vrot.slane %v35_v12, 4 }
  0x3a   :  { %v37_v14 = vadd.f32 %v36_v13, %v35_v12 }
  0x3c   :  { %v38_v15 = vrot.slane %v37_v14, 2 }
  0x3e   :  { %v39_v16 = vadd.f32 %v38_v15, %v37_v14 }
  0x40   :  { %v40_v17 = vrot.slane %v39_v16, 1 }
  0x42   :  { %v41_v18 = vadd.f32 %v40_v17, %v39_v16 }
  0x44   :  { %64 = vrcp.f32 %v41_v18 }
  0x4e   :  { %v65_v19 = vpop.eup %64 }
  0x4f   :  { %v43_v20 = vmul.f32 %v65_v19, %v34_v11 }
  0x51   :  { %44 = vst.msk [vmem:[#allocation5] sm:$0xff] %vm22_vm0, %v43_v20 }
  0x52   :  { %99 = shalt.err (!%p96_p12)
}
  0x53   :  { %s100_s22 = scalar_lea.hbm %s155_s1, 128 }
  0x54   :  { %p101_p13 = scmp.ne.s32.totalorder %s155_s1, %s100_s22  ;;  %p104_p0 = scmp.lt.u32.totalorder %s100_s22, %s155_s1 }
  0x56   :  { %p106_p1 = pnand %p104_p0, %p101_p13 }
  0x58   :  { %109 = shalt.err (!%p106_p1)
}
  0x59   :  { %54 = dma.vmem_to_hbm [thread:$0]  %s52_s18, 128, %s155_s1, [#allocation4]  }
  0x5a   :  { %112 = dma.done.wait [#allocation4], 128  }
  0x5b   :  { %113 = vsyncadd [#allocation4], 4294967168 }
  0x5c   :  { %58 = vsyncpa [#allocation3], 1 }
  0x5d   :  { %59 = vsyncpa [#allocation4], 1 }

</bundles_post_ra>
